<compile_context>
chip_gen: v7x
topology: tpu7x:2x2x1
jax: 0.10.0
libtpu: 0.0.40
codegen_flags: <defaults>
</compile_context>

<pallas_src>
import jax
import jax.numpy as jnp
from jax.experimental import pallas as pl
from jax.experimental.pallas import tpu as pltpu

NPARTS = 4            # opt.nparts implied by the forward (uses B3..B5, C2, C3)
FEATURE_DIM = 1280    # efficientnet-b0 _fc.in_features
NCLASSES = 16
BN_EPS = 1e-5

# Part-index groups, in the exact order the PyTorch forward appends to y['PCB'].
PART_GROUPS = [
    [0], [1], [2], [3],            # classifierA0..A3   (bottleneck 128)
    [0, 1], [1, 2], [2, 3],        # classifierB0..B2   (bottleneck 256)
    [0, 1, 2], [1, 2, 3],          # classifierC0..C1   (bottleneck 256)
    [0, 1, 2, 3],                  # classifierD0       (bottleneck 256)
    [0, 2], [0, 3], [1, 3],        # classifierB3..B5   (bottleneck 256)
    [0, 1, 3], [0, 2, 3],          # classifierC2..C3   (bottleneck 256)
]
BOTTLENECKS = [128] * 4 + [256] * 11
NUM_CLS_HEADS = len(PART_GROUPS)                      # 15

# Static combine plan: which heads use each part (8 each -> 128 output lanes),
# and for each head, its (part, column-slot) list (first entry carries b_eff).
PART_HEADS = [[i for i, g in enumerate(PART_GROUPS) if p in g]
              for p in range(NPARTS)]
HEADS_PER_PART = len(PART_HEADS[0])                   # 8
assert all(len(h) == HEADS_PER_PART for h in PART_HEADS)
LANES_PER_PART = HEADS_PER_PART * NCLASSES            # 128 (lane-dense)
HEAD_SLOTS = [[(p, PART_HEADS[p].index(i)) for p in grp]
              for i, grp in enumerate(PART_GROUPS)]


# --------------------------- Pallas kernel ----------------------------------

def _pcb_head_kernel(x_ref, w_ref, b_ref, o_ref):
    # One part's worth of the (collapsed) classifier:
    #   x_ref: (N, 1280)  bf16  pooled features of part j
    #   w_ref: (1280, 128) bf16 composed weights of the 8 heads using part j
    #   b_ref: (1, 128)   f32   head biases (only in the head's first part)
    #   o_ref: (N, 128)   f32   lane-dense partial logits
    o_ref[...] = (jnp.dot(x_ref[...], w_ref[...],
                          preferred_element_type=jnp.float32) + b_ref[...])


def run_pcb_heads(x_parts, w_part, b_part):
    """x_parts: (NPARTS, N, C) bf16; w_part: (NPARTS, C, 128) bf16;
    b_part: (NPARTS, 1, 128) f32  ->  (NPARTS, N, 128) f32 partial logits."""
    p, n, c = x_parts.shape
    return pl.pallas_call(
        _pcb_head_kernel,
        out_shape=jax.ShapeDtypeStruct((p, n, LANES_PER_PART), jnp.float32),
        grid=(p,),
        in_specs=[
            pl.BlockSpec((None, n, c), lambda j: (j, 0, 0)),
            pl.BlockSpec((None, c, LANES_PER_PART), lambda j: (j, 0, 0)),
            pl.BlockSpec((None, 1, LANES_PER_PART), lambda j: (j, 0, 0)),
        ],
        out_specs=pl.BlockSpec((None, n, LANES_PER_PART), lambda j: (j, 0, 0)),
        compiler_params=pltpu.CompilerParams(
            dimension_semantics=("parallel",),      # v7x megacore: 2 parts / TC
            vmem_limit_bytes=32 * 1024 * 1024,      # << 64 MiB v7x physical VMEM
        ),
    )(x_parts, w_part, b_part)


# --------------------------- parameter construction -------------------------

def init_head_params(key, ncls=NCLASSES):
    """Per-head f32 parameters matching the PyTorch init rules (eval mode)."""
    heads = []
    for i, (grp, nb) in enumerate(zip(PART_GROUPS, BOTTLENECKS)):
        din = len(grp) * FEATURE_DIM
        k1, k2, k3 = jax.random.split(jax.random.fold_in(key, i), 3)
        # Linear(din, nb): kaiming_normal_(mode='fan_out') -> std sqrt(2/nb), bias 0.
        w1 = jax.random.normal(k1, (din, nb), jnp.float32) * jnp.sqrt(2.0 / nb)
        b1 = jnp.zeros((nb,), jnp.float32)
        # BatchNorm1d(nb): weight ~ N(1, 0.02), bias 0, running stats (0, 1).
        gamma = 1.0 + 0.02 * jax.random.normal(k2, (nb,), jnp.float32)
        beta = jnp.zeros((nb,), jnp.float32)
        mu = jnp.zeros((nb,), jnp.float32)
        var = jnp.ones((nb,), jnp.float32)
        scale = gamma * jax.lax.rsqrt(var + BN_EPS)
        w1f = w1 * scale[None, :]                      # BN folded into Linear 1
        b1f = (b1 - mu) * scale + beta
        # classifier Linear(nb, ncls): weight ~ N(0, 0.001), bias 0.
        w2 = 0.001 * jax.random.normal(k3, (nb, ncls), jnp.float32)
        b2 = jnp.zeros((ncls,), jnp.float32)
        heads.append(dict(w1f=w1f, b1f=b1f, w2=w2, b2=b2, grp=tuple(grp)))
    return heads


def fold_params(heads, ncls=NCLASSES):
    """Collapse each head to a single affine map (f32 compose, single bf16
    cast) and regroup per part into (NPARTS, C, 128) / (NPARTS, 1, 128)."""
    w_slots = [[None] * HEADS_PER_PART for _ in range(NPARTS)]
    b_slots = [[None] * HEADS_PER_PART for _ in range(NPARTS)]
    for i, hp in enumerate(heads):
        grp = hp["grp"]
        w_eff = hp["w1f"] @ hp["w2"]                   # (din, 16)  f32 compose
        b_eff = hp["b1f"] @ hp["w2"] + hp["b2"]        # (16,)      f32
        for pos, p in enumerate(grp):
            s = PART_HEADS[p].index(i)
            w_slots[p][s] = w_eff[pos * FEATURE_DIM:(pos + 1) * FEATURE_DIM, :]
            # bias added exactly once (via the head's first part column block)
            b_slots[p][s] = b_eff if pos == 0 else jnp.zeros((ncls,), jnp.float32)
    w_part = jnp.stack([jnp.concatenate(w_slots[p], axis=1)
                        for p in range(NPARTS)], axis=0)          # (4, 1280, 128)
    b_part = jnp.stack([jnp.concatenate(b_slots[p], axis=0)[None, :]
                        for p in range(NPARTS)], axis=0)          # (4, 1, 128)
    return dict(w=w_part.astype(jnp.bfloat16), b=b_part)


# --------------------------- forward -----------------------------------------

def _pool_parts(feat_nchw):
    """AdaptiveAvgPool2d((NPARTS, 1)) + transpose(1,2) + squeeze, in part-major
    layout: (N, C, H, W) -> (NPARTS, N, C).  Tiny; XLA fuses with the casts."""
    n, c, h, w = feat_nchw.shape
    assert c == FEATURE_DIM and h % NPARTS == 0, "kernel assumes H % nparts == 0"
    hp = h // NPARTS
    pooled = feat_nchw.reshape(n, c, NPARTS, hp * w).mean(axis=-1)   # (N, C, 4)
    return jnp.transpose(pooled, (2, 0, 1))                           # (4, N, C)


def pcb_effi_forward(feat_nchw, params):
    """Forward of PCB_Effi (non-single_cls branch, eval mode)."""
    # dropout(p=0.5) on the pooled features: identity at inference.
    x_parts = _pool_parts(feat_nchw).astype(jnp.bfloat16)        # (4, N, 1280)
    out = run_pcb_heads(x_parts, params["w"], params["b"])       # (4, N, 128) f32
    preds = []
    for i in range(NUM_CLS_HEADS):
        acc = None
        for (p, s) in HEAD_SLOTS[i]:
            sl = out[p, :, s * NCLASSES:(s + 1) * NCLASSES]      # (N, 16)
            acc = sl if acc is None else acc + sl
        preds.append(acc)
    return {"PCB": preds}


def reference_forward(feat_nchw, heads):
    """Pure-JAX f32 reference of the original two-Linear ClassBlock heads."""
    n, c, h, w = feat_nchw.shape
    hp = h // NPARTS
    pooled = feat_nchw.reshape(n, c, NPARTS, hp * w).mean(axis=-1)   # (N, C, 4)
    x = jnp.transpose(pooled, (0, 2, 1))                              # (N, 4, C)
    outs = []
    for hpar in heads:
        xi = jnp.concatenate([x[:, j, :] for j in hpar["grp"]], axis=1)
        mid = xi @ hpar["w1f"] + hpar["b1f"]
        outs.append(mid @ hpar["w2"] + hpar["b2"])
    return outs


# --------------------------- demo / self-check -------------------------------

if __name__ == "__main__":
    key = jax.random.PRNGKey(0)
    kx, kp = jax.random.split(key)
    N, H, W = 2, 8, 4
    feat = jax.random.normal(kx, (N, FEATURE_DIM, H, W), jnp.float32)

    heads = init_head_params(kp)
    params = fold_params(heads)

    fwd = jax.jit(pcb_effi_forward)
    y = fwd(feat, params)
    jax.block_until_ready(y)

    assert len(y["PCB"]) == NUM_CLS_HEADS
    assert all(o.shape == (N, NCLASSES) for o in y["PCB"])
    assert all(bool(jnp.all(jnp.isfinite(o))) for o in y["PCB"])

    # Tolerance check vs. uncollapsed pure-JAX f32 reference (bf16 weights/x).
    ref = reference_forward(feat, heads)
    for got, want in zip(y["PCB"], ref):
        assert bool(jnp.allclose(got, want, atol=5e-3, rtol=5e-2)), (
            float(jnp.max(jnp.abs(got - want))))

    print("KERNEL_OK")
</pallas_src>

<mosaic_0001>
module attributes {stable_mosaic.version = 11 : i64} {
  func.func @_pcb_head_kernel(%arg0: i32, %arg1: memref<1x2x1280xbf16, #tpu.memory_space<vmem>>, %arg2: memref<1x1280x128xbf16, #tpu.memory_space<vmem>>, %arg3: memref<1x1x128xf32, #tpu.memory_space<vmem>>, %arg4: memref<1x2x128xf32, #tpu.memory_space<vmem>>) attributes {dimension_semantics = [#tpu.dimension_semantics<parallel>], iteration_bounds = array<i64: 4>, scalar_prefetch = 0 : i64, scratch_operands = 0 : i64, tpu.core_type = #tpu.core_type<tc>, window_params = [{transform_indices = @transform_0, window_bounds = array<i64: 1, 2, 1280>}, {transform_indices = @transform_1, window_bounds = array<i64: 1, 1280, 128>}, {transform_indices = @transform_2, window_bounds = array<i64: 1, 1, 128>}, {transform_indices = @transform_3, window_bounds = array<i64: 1, 2, 128>}]} {
    %c0 = arith.constant 0 : index
    %c0_0 = arith.constant 0 : index
    %c0_1 = arith.constant 0 : index
    %0 = vector.load %arg1[%c0, %c0_0, %c0_1] : memref<1x2x1280xbf16, #tpu.memory_space<vmem>>, vector<1x2x1280xbf16>
    %1 = vector.shape_cast %0 : vector<1x2x1280xbf16> to vector<2x1280xbf16>
    %c0_2 = arith.constant 0 : index
    %c0_3 = arith.constant 0 : index
    %c0_4 = arith.constant 0 : index
    %2 = vector.load %arg2[%c0_2, %c0_3, %c0_4] : memref<1x1280x128xbf16, #tpu.memory_space<vmem>>, vector<1x1280x128xbf16>
    %3 = vector.shape_cast %2 : vector<1x1280x128xbf16> to vector<1280x128xbf16>
    %cst = arith.constant dense<0.000000e+00> : vector<2x128xf32>
    %4 = tpu.matmul %1, %3, %cst {dimension_numbers = #tpu.dot_dimension_numbers<[1], [0], [0], [1], [0, 0, 1, 1], [], []>} : vector<2x1280xbf16>, vector<1280x128xbf16>, vector<2x128xf32> -> vector<2x128xf32>
    %c0_5 = arith.constant 0 : index
    %c0_6 = arith.constant 0 : index
    %c0_7 = arith.constant 0 : index
    %5 = vector.load %arg3[%c0_5, %c0_6, %c0_7] : memref<1x1x128xf32, #tpu.memory_space<vmem>>, vector<1x1x128xf32>
    %6 = vector.shape_cast %5 : vector<1x1x128xf32> to vector<1x128xf32>
    %7 = vector.broadcast %6 : vector<1x128xf32> to vector<2x128xf32>
    %8 = arith.addf %4, %7 : vector<2x128xf32>
    %c0_8 = arith.constant 0 : index
    %c0_9 = arith.constant 0 : index
    %c0_10 = arith.constant 0 : index
    %9 = vector.load %arg4[%c0_8, %c0_9, %c0_10] : memref<1x2x128xf32, #tpu.memory_space<vmem>>, vector<1x2x128xf32>
    %10 = vector.shape_cast %9 : vector<1x2x128xf32> to vector<2x128xf32>
    %11 = vector.shape_cast %8 : vector<2x128xf32> to vector<1x2x128xf32>
    tpu.vector_store %arg4[%c0_8, %c0_9, %c0_10], %11 {strides = array<i32>} : memref<1x2x128xf32, #tpu.memory_space<vmem>>, vector<1x2x128xf32>,
    return
  }
  func.func @transform_0(%arg0: i32) -> (i32, i32, i32) {
    %c0_i32 = arith.constant 0 : i32
    %c0_i32_0 = arith.constant 0 : i32
    %c0_i32_1 = arith.constant 0 : i32
    return %arg0, %c0_i32, %c0_i32_0 : i32, i32, i32
  }
  func.func @transform_1(%arg0: i32) -> (i32, i32, i32) {
    %c0_i32 = arith.constant 0 : i32
    %c0_i32_0 = arith.constant 0 : i32
    %c0_i32_1 = arith.constant 0 : i32
    return %arg0, %c0_i32, %c0_i32_0 : i32, i32, i32
  }
  func.func @transform_2(%arg0: i32) -> (i32, i32, i32) {
    %c0_i32 = arith.constant 0 : i32
    %c0_i32_0 = arith.constant 0 : i32
    %c0_i32_1 = arith.constant 0 : i32
    return %arg0, %c0_i32, %c0_i32_0 : i32, i32, i32
  }
  func.func @transform_3(%arg0: i32) -> (i32, i32, i32) {
    %c0_i32 = arith.constant 0 : i32
    %c0_i32_0 = arith.constant 0 : i32
    %c0_i32_1 = arith.constant 0 : i32
    return %arg0, %c0_i32, %c0_i32_0 : i32, i32, i32
  }
}

</mosaic_0001>

<bundles_post_ra>
// kernel: pcb_effi_forward.1
= control target key start
LH: loop header
LB: loop body
LE: loop exit
PB: predicated region body
PF: predicated region fallthrough
CT: control target
= control target key end

     0   :  { %8 = vsyncpa [#allocation3], 0  ;;  %s1993_s0 = inlined_call_operand.vmem [shape: bf16[4,2,1280], index: 0, kind: input, shape index: {}]   ;;  %s1994_s1 = inlined_call_operand.hbm [shape: bf16[4,1280,128], index: 1, kind: input, shape index: {}]   ;;  %s1995_s2 = inlined_call_operand.hbm [shape: f32[4,1,128], index: 2, kind: input, shape index: {}]   ;;  %s1996_s3 = inlined_call_operand.vmem [shape: f32[4,2,128], index: 3, kind: output, shape index: {}]  }
   0x1   :  { %10 = vsyncpa [#allocation3 + $0x1], 0 }
   0x2   :  { %11 = vsyncpa [#allocation5], 0 }
   0x3   :  { %13 = vsyncpa [#allocation5 + $0x1], 0  ;;  %s1729_s12 = smov 0   ;;  %s1731_s13 = smov 0  }
   0x4   :  { %s1733_s14 = smov 0   ;;  %s1735_s15 = smov 0  }
   0x5 LB: > { %s1748_s16 = sadd.s32 4294967295, %s1702_s15   ;;  %s1751_s17 = sadd.s32 1, %s1702_s15   ;;  %s1702_s15 = sphi %s1735_s15, %s2007_s15   ;;  %s1698_s14 = sphi %s1733_s14, %s2006_s14   ;;  %s1694_s13 = sphi %s1731_s13, %s2005_s13   ;;  %s1690_s12 = sphi %s1729_s12, %s2004_s12  }
   0x6   : > { %s49_s18 = ssub.s32 %s1702_s15, %s1751_s17  ;;  %s52_s19 = sadd.s32 1, %s1698_s14 }
   0x7   : > { %p50_p0 = scmp.eq.s32.totalorder %s49_s18, 0  ;;  %p59_p1 = scmp.ne.s32.totalorder %s1698_s14, %s1694_s13 }
   0x8   : > { %p60_p2 = scmp.eq.s32.totalorder %s1702_s15, 0  ;;  %p65_p3 = scmp.ne.s32.totalorder %s1694_s13, %s1690_s12 }
   0x9   : > { %s1761_s20 = scalar_select %p50_p0, %s1698_s14, %s52_s19  }
   0xa   : > { %p61_p4 = por %p60_p2, %p59_p1  ;;  %p66_p5 = scmp.eq.s32.totalorder %s1748_s16, 0 }
   0xb   : > { %p1487_p6 = scmp.lt.s32.totalorder %s1702_s15, 4  ;;  %s1770_s22 = sand.u32 1, %s1698_s14  }
   0xc   : > { %p1765_p7 = por %p66_p5, %p65_p3  ;;  %s1472_s23 = smul.u32 640, %s1770_s22 }
   0xd   : > { %s1473_s24 = smul.u32 10240, %s1702_s15  ;;  %p1774_p8 = pnand %p1487_p6, %p61_p4 }
   0xe   : > { %s1998_s21 = scalar_select %p1765_p7, 1, 0 }
   0xf   : > { %s1781_s28 = scalar_lea.hbm %s1994_s1, %s1473_s24  ;;  %s152_s29 = scalar_lea.vmem [#allocation2], %s1472_s23 }
  0x10   : > { %s159_s30 = sshll.u32 %s152_s29, 4  ;;  %s149_s4 = scalar_lea.sflag [#allocation3], %s1770_s22  ;;  %s1783_s30 = int_to_ptr.vmem [resolvable:$true] %s159_s30 }
  0x11   : > { %s1604_s5 = scalar_lea.hbm %s1781_s28, 10240  ;;  %p1606_p11 = pneg %p1774_p8 }
  0x12   : > { %p1605_p10 = scmp.ne.s32.totalorder %s1781_s28, %s1604_s5  ;;  %s1609_s8 = scalar_lea.hbm %s1994_s1, 40960 }
  0x13   : > { %p1610_p0 = scmp.lt.u32.totalorder %s1781_s28, %s1994_s1  ;;  %p1611_p1 = scmp.lt.u32.totalorder %s1609_s8, %s1604_s5 }
  0x14   : > { %p1607_p12 = pnand %p1606_p11, %p1605_p10  ;;  %p1613_p3 = scmp.lt.u32.totalorder %s1604_s5, %s1781_s28 }
  0x15   : > { %p1612_p2 = por %p1611_p1, %p1610_p0 }
  0x16   : > { %p1608_p13 = pneg %p1607_p12 }
  0x17   : > { %p1614_p4 = por %p1613_p3, %p1612_p2 }
  0x19   : > { %p1615_p5 = pnand %p1614_p4, %p1608_p13 }
  0x1b   : > { %1618 = shalt.err (!%p1615_p5)
}
  0x1c   : > { %s1619_s11 = scalar_lea.vmem %s1783_s30, 10240  ;;  %s1704_s12 = smov [#allocation2]  }
  0x1d   : > { %p1620_p6 = scmp.ne.s32.totalorder %s1783_s30, %s1619_s11  ;;  %s1624_s18 = sshll.u32 %s1704_s12, 4  ;;  %s1625_s18 = int_to_ptr.vmem [resolvable:$false] %s1624_s18 }
  0x1e   : > { %s1626_s19 = scalar_lea.vmem %s1625_s18, 20480  ;;  %p1627_p9 = scmp.lt.s32.totalorder %s1783_s30, %s1625_s18 }
  0x1f   : > { %p1622_p10 = pnand %p1620_p6, %p1606_p11  ;;  %p1628_p0 = scmp.lt.s32.totalorder %s1626_s19, %s1619_s11 }
  0x21   : > { %p1623_p12 = pneg %p1622_p10  ;;  %p1629_p1 = por %p1628_p0, %p1627_p9 }
  0x23   : > { %p1630_p2 = pnand %p1629_p1, %p1623_p12 }
  0x25   : > { %1633 = shalt.err (!%p1630_p2)
}
  0x26   : > { %s1705_s23 = smov 64   ;;  %s1706_s24 = smov 4  }
  0x27   : > { %1483 = dma.hbm_to_vmem [thread:$0]  (!%p1774_p8), %s1781_s28, 10240, %s1783_s30, %s149_s4, %s1705_s23, %s1705_s23, %s1706_s24  }
  0x28   : > { %p184_p13 = scmp.lt.s32.totalorder %s1702_s15, 5  ;;  %s1275_s26 = sshll.u32 %s1702_s15, 4 }
  0x29   : > { %p2000_p9 = scmp.ge.s32.totalorder %s1702_s15, 1  ;;  %s1825_s6 = scalar_lea.hbm %s1995_s2, %s1275_s26 }
  0x2a   : > { %s172_s7 = scalar_lea.vmem [#allocation4], %s1770_s22  ;;  %s170_s28 = scalar_lea.sflag [#allocation5], %s1770_s22 }
  0x2b   : > { %p1818_p3 = pnand %p2000_p9, %p184_p13  ;;  %s179_s8 = sshll.u32 %s172_s7, 4  ;;  %s180_s8 = int_to_ptr.vmem [resolvable:$true] %s179_s8 }
  0x2c   : > { %s1634_s30 = scalar_lea.hbm %s1825_s6, 16  ;;  %s1639_s9 = scalar_lea.hbm %s1995_s2, 64 }
  0x2d   : > { %s2001_s27 = scalar_select %p1818_p3, 1, 0 }
  0x2e   : > { %p1635_p4 = scmp.ne.s32.totalorder %s1825_s6, %s1634_s30  ;;  %p1640_p10 = scmp.lt.u32.totalorder %s1825_s6, %s1995_s2 }
  0x2f   : > { %p1641_p12 = scmp.lt.u32.totalorder %s1639_s9, %s1634_s30  ;;  %p1643_p1 = scmp.lt.u32.totalorder %s1634_s30, %s1825_s6 }
  0x30   : > { %p1637_p5 = pnand %p1635_p4, %p1606_p11 }
  0x31   : > { %p1642_p0 = por %p1641_p12, %p1640_p10 }
  0x32   : > { %p1638_p6 = pneg %p1637_p5 }
  0x33   : > { %p1644_p2 = por %p1643_p1, %p1642_p0 }
  0x35   : > { %p1645_p13 = pnand %p1644_p2, %p1638_p6 }
  0x37   : > { %1648 = shalt.err (!%p1645_p13)
}
  0x38   : > { %s1649_s22 = scalar_lea.vmem %s180_s8, 16  ;;  %s1707_s12 = smov [#allocation4]  }
  0x39   : > { %p1650_p9 = scmp.ne.s32.totalorder %s180_s8, %s1649_s22  ;;  %s1654_s18 = sshll.u32 %s1707_s12, 4  ;;  %s1655_s18 = int_to_ptr.vmem [resolvable:$false] %s1654_s18 }
  0x3a   : > { %s1656_s19 = scalar_lea.vmem %s1655_s18, 32  ;;  %p1657_p7 = scmp.lt.s32.totalorder %s180_s8, %s1655_s18 }
  0x3b   : > { %p1652_p4 = pnand %p1650_p9, %p1606_p11  ;;  %p1658_p3 = scmp.lt.s32.totalorder %s1656_s19, %s1649_s22 }
  0x3d   : > { %p1653_p5 = pneg %p1652_p4  ;;  %p1659_p10 = por %p1658_p3, %p1657_p7 }
  0x3f   : > { %p1660_p12 = pnand %p1659_p10, %p1653_p5 }
  0x41   : > { %1663 = shalt.err (!%p1660_p12)
}
  0x42   : > { %1486 = dma.hbm_to_vmem [thread:$0]  (!%p1774_p8), %s1825_s6, 16, %s180_s8, %s170_s28  }
  0x43   : > { %p2002_p6 = scmp.ne.s32.totalorder %s2001_s27, 0 }
  0x44   : > { %s1851_s23 = sand.u32 (!%p2002_p6), 1, %s1694_s13   ;;  %p2003_p7 = scmp.ne.s32.totalorder (!%p2002_p6), %s1998_s21, 0 }
  0x45   : > { %188 = sbr.rel (%p2002_p6) target bundleno = 394 (0x18a), region = 32  ;;  %s191_s26 = scalar_lea.sflag (!%p2002_p6), [#allocation3], %s1851_s23 }
  0x46   : > { %s1474_s24 = smul.u32 (!%p2002_p6), 640, %s1851_s23 }
  0x48   : > { %s1855_s29 = scalar_lea.vmem (!%p2002_p6), [#allocation2], %s1474_s24 }
  0x4c   : > { %1681 = dma.done.wait (%p2003_p7), %s191_s26, 10240  }
  0x4d   : > { %1683 = vsyncadd (%p2003_p7), %s191_s26, 4294957056  ;;  %s200_s25 = scalar_lea.sflag [#allocation5], %s1851_s23  ;;  %s202_s27 = scalar_lea.vmem [#allocation4], %s1851_s23 }
  0x4e   : > { %1685 = dma.done.wait (%p2003_p7), %s200_s25, 16  }
  0x4f   : > { %1687 = vsyncadd (%p2003_p7), %s200_s25, 4294967280  ;;  %v1523_v0 = vld [vmem:[%s1855_s29 + $0x40] sm:$0xff]   ;;  %v1527_v4 = vld [vmem:[%s1855_s29 + $0x48] sm:$0xff]   ;;  %p232_p8 = scmp.lt.s32.totalorder %s1748_s16, 3  ;;  %v416_v20 = vlaneseq  ;;  %v1708_v22 = vmov 1966171168  }
  0x50   : > { %v1524_v1 = vld [vmem:[%s1855_s29] sm:$0xff]   ;;  %1362 = vmatprep.subr.bf16.mxu0 %v1523_v0  ;;  %v1528_v5 = vld [vmem:[%s1855_s29 + $0x8] sm:$0xff]   ;;  %v1531_v8 = vld [vmem:[%s1855_s29 + $0x50] sm:$0xff]   ;;  %v414_v23 = vunpack.c.l.s4 %v1708_v22 }
  0x51   : > { %v1525_v2 = vld [vmem:[%s1855_s29 + $0xc0] sm:$0xff]   ;;  %1363 = vmatpush3.bf16.msra.mxu0 %v1524_v1  ;;  %v1529_v6 = vld [vmem:[%s1855_s29 + $0xc8] sm:$0xff]   ;;  %v1532_v9 = vld [vmem:[%s1855_s29 + $0x10] sm:$0xff]   ;;  %s2009_s16 = smov (!%p232_p8, %s1748_s16), 3  ;;  %v417_v27 = vshrl.u32 %v416_v20, 7 }
  0x52   : > { %v1526_v3 = vld [vmem:[%s1855_s29 + $0x80] sm:$0xff]   ;;  %1384 = vmatprep.subr.bf16.mxu1 %v1525_v2  ;;  %1364 = vmatprep.subr.bf16.mxu0 %v1527_v4  ;;  %v1530_v7 = vld [vmem:[%s1855_s29 + $0x88] sm:$0xff]   ;;  %v1533_v10 = vld [vmem:[%s1855_s29 + $0xd0] sm:$0xff]   ;;  %s1475_s21 = smul.u32 10, %s2009_s16  ;;  %v415_v29 = vunpack.c.0.s8 %v414_v23  ;;  %s1277_s8 = sshll.u32 %s2009_s16, 1 }
  0x53   : > { %1385 = vmatpush3.bf16.msra.mxu1 %v1526_v3  ;;  %v1534_v11 = vld [vmem:[%s1855_s29 + $0x90] sm:$0xff]   ;;  %v1535_v12 = vld [vmem:[%s1855_s29 + $0x58] sm:$0xff]   ;;  %v1539_v16 = vld [vmem:[%s1855_s29 + $0x60] sm:$0xff]   ;;  %s239_s15 = scalar_lea.vmem %s1996_s3, %s1277_s8 }
  0x54   : > { %1386 = vmatprep.subr.bf16.mxu1 %v1529_v6  ;;  %v1536_v13 = vld [vmem:[%s1855_s29 + $0x18] sm:$0xff]   ;;  %v1540_v17 = vld [vmem:[%s1855_s29 + $0x20] sm:$0xff]   ;;  %v1543_v21 = vld [vmem:[%s1855_s29 + $0x68] sm:$0xff]   ;;  %s1904_s7 = scalar_lea.vmem %s1993_s0, %s1475_s21  ;;  %v1906_v34 = vsub.s32 %v415_v29, %v417_v27 }
  0x55   : > { %1365 = vmatpush3.bf16.msra.mxu0 %v1528_v5  ;;  %v1537_v14 = vld [vmem:[%s1855_s29 + $0xd8] sm:$0xff]   ;;  %v1541_v18 = vld [vmem:[%s1855_s29 + $0xe0] sm:$0xff]   ;;  %v1544_v24 = vld [vmem:[%s1855_s29 + $0x28] sm:$0xff]  }
  0x56   : > { %1366 = vmatprep.subr.bf16.mxu0 %v1531_v8  ;;  %v1538_v15 = vld [vmem:[%s1855_s29 + $0x98] sm:$0xff]   ;;  %v1542_v19 = vld [vmem:[%s1855_s29 + $0xa0] sm:$0xff]   ;;  %v1545_v25 = vld [vmem:[%s1855_s29 + $0xe8] sm:$0xff]  }
  0x57   : > { %1387 = vmatpush3.bf16.msra.mxu1 %v1530_v7  ;;  %v1546_v26 = vld [vmem:[%s1855_s29 + $0xa8] sm:$0xff]   ;;  %v1547_v28 = vld [vmem:[%s1855_s29 + $0x70] sm:$0xff]   ;;  %v1551_v33 = vld [vmem:[%s1855_s29 + $0x78] sm:$0xff]  }
  0x58   : > { %1388 = vmatprep.subr.bf16.mxu1 %v1533_v10  ;;  %v1548_v30 = vld [vmem:[%s1855_s29 + $0x30] sm:$0xff]   ;;  %v1552_v35 = vld [vmem:[%s1855_s29 + $0x38] sm:$0xff]   ;;  %v241_v37 = vld [vmem:[%s1904_s7] sm:$0xff] }
  0x59   : > { %1367 = vmatpush3.bf16.msra.mxu0 %v1532_v9  ;;  %v1549_v31 = vld [vmem:[%s1855_s29 + $0xf0] sm:$0xff]   ;;  %v1553_v36 = vld [vmem:[%s1855_s29 + $0xf8] sm:$0xff]   ;;  %v412_v38 = vcombine.high %v241_v37, %v241_v37  ;;  %v419_v39 = vrot.slane %v241_v37, %v1906_v34  ;;  %v1556_v41 = vld [vmem:[%s1855_s29 + $0x140] sm:$0xff]  }
  0x5a   : > { %1368 = vmatprep.subr.bf16.mxu0 %v1535_v12  ;;  %v1550_v32 = vld [vmem:[%s1855_s29 + $0xb0] sm:$0xff]   ;;  %v1555_v40 = vld [vmem:[%s1855_s29 + $0xb8] sm:$0xff]   ;;  %v1558_v45 = vld [vmem:[%s1855_s29 + $0x1c0] sm:$0xff]  }
  0x5b   : > { %1389 = vmatpush3.bf16.msra.mxu1 %v1534_v11  ;;  %v427_v42 = vcombine.high %v419_v39, %v419_v39  ;;  %v435_v43 = vrot.slane %v419_v39, %v1906_v34  ;;  %v1916_v44 = vrot.slane %v412_v38, %v1906_v34  ;;  %v1557_v47 = vld [vmem:[%s1855_s29 + $0x100] sm:$0xff]   ;;  %v1560_v50 = vld [vmem:[%s1855_s29 + $0x148] sm:$0xff]   ;;  %v1564_v57 = vld [vmem:[%s1855_s29 + $0x150] sm:$0xff]  }
  0x5c   : > { %1390 = vmatprep.subr.bf16.mxu1 %v1537_v14  ;;  %v1559_v52 = vld [vmem:[%s1855_s29 + $0x180] sm:$0xff]   ;;  %v1562_v54 = vld [vmem:[%s1855_s29 + $0x1c8] sm:$0xff]   ;;  %v1566_v59 = vld [vmem:[%s1855_s29 + $0x1d0] sm:$0xff]  }
  0x5d   : > { %1369 = vmatpush3.bf16.msra.mxu0 %v1536_v13  ;;  %v449_v46 = vrot.slane %v427_v42, %v1906_v34  ;;  %v428_v48 = vcombine.high %v1916_v44, %v1916_v44  ;;  %v457_v49 = vcombine.high %v435_v43, %v435_v43  ;;  %v1561_v55 = vld [vmem:[%s1855_s29 + $0x108] sm:$0xff]   ;;  %v1565_v60 = vld [vmem:[%s1855_s29 + $0x110] sm:$0xff]   ;;  %v1568_v61 = vld [vmem:[%s1855_s29 + $0x158] sm:$0xff]  }
  0x5e   : > { %1370 = vmatprep.subr.bf16.mxu0 %v1539_v16  ;;  %v1563_v58 = vld [vmem:[%s1855_s29 + $0x188] sm:$0xff]   ;;  %v1567_v62 = vld [vmem:[%s1855_s29 + $0x190] sm:$0xff]   ;;  %v1570_v63 = vld [vmem:[%s1855_s29 + $0x1d8] sm:$0xff]  }
  0x5f   : > { %1391 = vmatpush3.bf16.msra.mxu1 %v1538_v15  ;;  %1005 = vmatprep.mubr.bf16.mxu0 %v449_v46  ;;  %v459_v51 = vcombine.high %v449_v46, %v449_v46  ;;  %v456_v53 = vrot.slane %v428_v48, %v1906_v34  ;;  %v1569_v0 = vld [vmem:[%s1855_s29 + $0x118] sm:$0xff]   ;;  %v1572_v1 = vld [vmem:[%s1855_s29 + $0x160] sm:$0xff]   ;;  %v1576_v5 = vld [vmem:[%s1855_s29 + $0x168] sm:$0xff]  }
  0x60   : > { %1392 = vmatprep.subr.bf16.mxu1 %v1541_v18  ;;  %v1571_v2 = vld [vmem:[%s1855_s29 + $0x198] sm:$0xff]   ;;  %v1574_v3 = vld [vmem:[%s1855_s29 + $0x1e0] sm:$0xff]   ;;  %v1578_v7 = vld [vmem:[%s1855_s29 + $0x1e8] sm:$0xff]  }
  0x61   : > { %1371 = vmatpush3.bf16.msra.mxu0 %v1540_v17  ;;  %1045 = vmatprep.mubr.bf16.mxu1 %v459_v51  ;;  %v460_v56 = vcombine.high %v456_v53, %v456_v53  ;;  %v1573_v4 = vld [vmem:[%s1855_s29 + $0x120] sm:$0xff]   ;;  %v1577_v8 = vld [vmem:[%s1855_s29 + $0x128] sm:$0xff]   ;;  %v1580_v9 = vld [vmem:[%s1855_s29 + $0x170] sm:$0xff]   ;;  %v442_v17 = vrot.slane %v1916_v44, %v1906_v34 }
  0x62   : > { %1372 = vmatprep.subr.bf16.mxu0 %v1543_v21  ;;  %v1575_v6 = vld [vmem:[%s1855_s29 + $0x1a0] sm:$0xff]   ;;  %v1579_v10 = vld [vmem:[%s1855_s29 + $0x1a8] sm:$0xff]   ;;  %v1582_v11 = vld [vmem:[%s1855_s29 + $0x1f0] sm:$0xff]  }
  0x63   : > { %1393 = vmatpush3.bf16.msra.mxu1 %v1542_v19  ;;  %v1581_v12 = vld [vmem:[%s1855_s29 + $0x130] sm:$0xff]   ;;  %v1584_v13 = vld [vmem:[%s1855_s29 + $0x178] sm:$0xff]   ;;  %v1588_v18 = vld [vmem:[%s1855_s29 + $0x240] sm:$0xff]   ;;  %v458_v21 = vcombine.high %v442_v17, %v442_v17 }
  0x64   : > { %1394 = vmatprep.subr.bf16.mxu1 %v1545_v25  ;;  %v1583_v14 = vld [vmem:[%s1855_s29 + $0x1b0] sm:$0xff]   ;;  %v1586_v15 = vld [vmem:[%s1855_s29 + $0x1f8] sm:$0xff]   ;;  %v1589_v20 = vld [vmem:[%s1855_s29 + $0x200] sm:$0xff]  }
  0x65   : > { %1373 = vmatpush3.bf16.msra.mxu0 %v1544_v24  ;;  %v1585_v16 = vld [vmem:[%s1855_s29 + $0x138] sm:$0xff]   ;;  %v1590_v22 = vld [vmem:[%s1855_s29 + $0x248] sm:$0xff]   ;;  %v1592_v24 = vld [vmem:[%s1855_s29 + $0x250] sm:$0xff]  }
  0x66   : > { %1374 = vmatprep.subr.bf16.mxu0 %v1547_v28  ;;  %v1587_v19 = vld [vmem:[%s1855_s29 + $0x1b8] sm:$0xff]   ;;  %v1591_v23 = vld [vmem:[%s1855_s29 + $0x208] sm:$0xff]   ;;  %v1593_v25 = vld [vmem:[%s1855_s29 + $0x210] sm:$0xff]  }
  0x67   : > { %1395 = vmatpush3.bf16.msra.mxu1 %v1546_v26  ;;  %v1594_v26 = vld [vmem:[%s1855_s29 + $0x258] sm:$0xff]   ;;  %v1279_v28 = vld.sshfl [vmem:[%s1904_s7 + $0x8] sm:$0x11 pattern:$0x75316420]  ;;  %v1596_v29 = vld [vmem:[%s1855_s29 + $0x260] sm:$0xff]  }
  0x68   : > { %1396 = vmatprep.subr.bf16.mxu1 %v1549_v31  ;;  %v1595_v27 = vld [vmem:[%s1855_s29 + $0x218] sm:$0xff]   ;;  %v1601_v37 = vld [vmem:[%s1855_s29 + $0x230] sm:$0xff]   ;;  %v1278_v42 = vld [vmem:[%s202_s27] ss:$0 sm:$0xff] }
  0x69   : > { %1375 = vmatpush3.bf16.msra.mxu0 %v1548_v30  ;;  %v468_v30 = vcombine.high %v1279_v28, %v1279_v28  ;;  %v1602_v38 = vld [vmem:[%s1855_s29 + $0x278] sm:$0xff]  }
  0x6a   : > { %1376 = vmatprep.subr.bf16.mxu0 %v1551_v33  ;;  %v1598_v33 = vld [vmem:[%s1855_s29 + $0x268] sm:$0xff]   ;;  %v1603_v39 = vld [vmem:[%s1855_s29 + $0x238] sm:$0xff]  }
  0x6b   : > { %1397 = vmatpush3.bf16.msra.mxu1 %v1550_v32  ;;  %v482_v31 = vrot.slane %v468_v30, %v1906_v34  ;;  %v1597_v32 = vld [vmem:[%s1855_s29 + $0x220] sm:$0xff]  }
  0x6c   : > { %1398 = vmatprep.subr.bf16.mxu1 %v1553_v36  ;;  %v1600_v36 = vld [vmem:[%s1855_s29 + $0x270] sm:$0xff]  }
  0x6d   : > { %1377 = vmatpush3.bf16.msra.mxu0 %v1552_v35  ;;  %v1599_v35 = vld [vmem:[%s1855_s29 + $0x228] sm:$0xff]  }
  0x6e   : > { %1406 = vmatprep.subr.bf16.mxu0 %v1556_v41 }
  0x6f   : > { %1399 = vmatpush3.bf16.msra.mxu1 %v1555_v40  ;;  %v475_v40 = vrot.slane %v1279_v28, %v1906_v34 }
  0x70   : > { %1428 = vmatprep.subr.bf16.mxu1 %v1558_v45  ;;  %1006 = vmatmul.mubr.bf16.vlgmr.msra.gmra.mrb[0].mxu0 %v435_v43 }
  0x71   : > { %1407 = vmatpush3.bf16.msra.mxu0 %v1557_v47  ;;  %1085 = vmatprep.mubr.bf16.mxu0 %v456_v53 }
  0x72   : > { %1046 = vmatmul.mubr.bf16.vlgmr.msra.gmra.mrb[0].mxu1 %v457_v49  ;;  %1408 = vmatprep.subr.bf16.mxu0 %v1560_v50 }
  0x73   : > { %1429 = vmatpush3.bf16.msra.mxu1 %v1559_v52  ;;  %1125 = vmatprep.mubr.bf16.mxu1 %v460_v56 }
  0x74   : > { %1430 = vmatprep.subr.bf16.mxu1 %v1562_v54 }
  0x75   : > { %1409 = vmatpush3.bf16.msra.mxu0 %v1561_v55 }
  0x76   : > { %1410 = vmatprep.subr.bf16.mxu0 %v1564_v57 }
  0x77   : > { %1431 = vmatpush3.bf16.msra.mxu1 %v1563_v58 }
  0x78   : > { %1432 = vmatprep.subr.bf16.mxu1 %v1566_v59 }
  0x79   : > { %1411 = vmatpush3.bf16.msra.mxu0 %v1565_v60 }
  0x7a   : > { %1412 = vmatprep.subr.bf16.mxu0 %v1568_v61 }
  0x7b   : > { %1433 = vmatpush3.bf16.msra.mxu1 %v1567_v62 }
  0x7c   : > { %1434 = vmatprep.subr.bf16.mxu1 %v1570_v63 }
  0x7d   : > { %1413 = vmatpush3.bf16.msra.mxu0 %v1569_v0 }
  0x7e   : > { %1414 = vmatprep.subr.bf16.mxu0 %v1572_v1 }
  0x7f   : > { %1435 = vmatpush3.bf16.msra.mxu1 %v1571_v2 }
  0x80   : > { %1436 = vmatprep.subr.bf16.mxu1 %v1574_v3 }
  0x81   : > { %1415 = vmatpush3.bf16.msra.mxu0 %v1573_v4 }
  0x82   : > { %1416 = vmatprep.subr.bf16.mxu0 %v1576_v5 }
  0x83   : > { %1437 = vmatpush3.bf16.msra.mxu1 %v1575_v6 }
  0x84   : > { %1438 = vmatprep.subr.bf16.mxu1 %v1578_v7 }
  0x85   : > { %1417 = vmatpush3.bf16.msra.mxu0 %v1577_v8 }
  0x86   : > { %1418 = vmatprep.subr.bf16.mxu0 %v1580_v9 }
  0x87   : > { %1439 = vmatpush3.bf16.msra.mxu1 %v1579_v10 }
  0x88   : > { %1440 = vmatprep.subr.bf16.mxu1 %v1582_v11 }
  0x89   : > { %1419 = vmatpush3.bf16.msra.mxu0 %v1581_v12 }
  0x8a   : > { %1420 = vmatprep.subr.bf16.mxu0 %v1584_v13 }
  0x8b   : > { %1441 = vmatpush3.bf16.msra.mxu1 %v1583_v14 }
  0x8c   : > { %1442 = vmatprep.subr.bf16.mxu1 %v1586_v15 }
  0x8d   : > { %1421 = vmatpush3.bf16.msra.mxu0 %v1585_v16 }
  0x8e   : > { %1450 = vmatprep.subr.bf16.mxu0 %v1588_v18 }
  0x8f   : > { %1443 = vmatpush3.bf16.msra.mxu1 %v1587_v19 }
  0x90   : > { %1086 = vmatmul.mubr.bf16.vlgmr.msra.gmra.mrb[4].mxu0 %v442_v17 }
  0x91   : > { %1451 = vmatpush3.bf16.msra.mxu0 %v1589_v20  ;;  %1165 = vmatprep.mubr.bf16.mxu0 %v482_v31 }
  0x92   : > { %1126 = vmatmul.mubr.bf16.vlgmr.msra.gmra.mrb[4].mxu1 %v458_v21  ;;  %1452 = vmatprep.subr.bf16.mxu0 %v1590_v22 }
  0x95   : > { %1453 = vmatpush3.bf16.msra.mxu0 %v1591_v23 }
  0x96   : > { %1454 = vmatprep.subr.bf16.mxu0 %v1592_v24 }
  0x99   : > { %1455 = vmatpush3.bf16.msra.mxu0 %v1593_v25 }
  0x9a   : > { %1456 = vmatprep.subr.bf16.mxu0 %v1594_v26 }
  0x9d   : > { %1457 = vmatpush3.bf16.msra.mxu0 %v1595_v27 }
  0x9e   : > { %1458 = vmatprep.subr.bf16.mxu0 %v1596_v29 }
  0xa1   : > { %1459 = vmatpush3.bf16.msra.mxu0 %v1597_v32 }
  0xa2   : > { %1460 = vmatprep.subr.bf16.mxu0 %v1598_v33 }
  0xa5   : > { %1461 = vmatpush3.bf16.msra.mxu0 %v1599_v35 }
  0xa6   : > { %1462 = vmatprep.subr.bf16.mxu0 %v1600_v36 }
  0xa9   : > { %1463 = vmatpush3.bf16.msra.mxu0 %v1601_v37 }
  0xaa   : > { %1464 = vmatprep.subr.bf16.mxu0 %v1602_v38 }
  0xad   : > { %1465 = vmatpush3.bf16.msra.mxu0 %v1603_v39 }
  0xb0   : > { %1166 = vmatmul.mubr.bf16.vlgmr.msra.gmra.mrb[8].mxu0 %v475_v40 }
 0x143   : > { %v1378_v41 = vpop.f32.mrb[0].mxu0 }
 0x144   : > { %v1379_v43 = vpop.f32.mrb[1].mxu0 }
 0x145   : > { %v1380_v44 = vadd.f32 %v1379_v43, %v1378_v41  ;;  %v1381_v45 = vpop.f32.mrb[2].mxu0  ;;  %v1400_v46 = vpop.f32.mrb[0].mxu1 }
 0x146   : > { %v1382_v47 = vpop.f32.mrb[3].mxu0  ;;  %v1401_v48 = vpop.f32.mrb[1].mxu1 }
 0x147   : > { %v1008_v49 = vadd.f32 %v1380_v44, %v1278_v42  ;;  %v1402_v50 = vadd.f32 %v1401_v48, %v1400_v46  ;;  %v1403_v51 = vpop.f32.mrb[2].mxu1 }
 0x148   : > { %v1404_v52 = vpop.f32.mrb[3].mxu1 }
 0x149   : > { %v1048_v53 = vadd.f32 %v1402_v50, %v1008_v49 }
 0x163   : > { %v1422_v54 = vpop.f32.mrb[4].mxu0 }
 0x164   : > { %v1423_v55 = vpop.f32.mrb[5].mxu0 }
 0x165   : > { %v1424_v34 = vadd.f32 %v1423_v55, %v1422_v54  ;;  %v1425_v56 = vpop.f32.mrb[6].mxu0  ;;  %v1444_v57 = vpop.f32.mrb[4].mxu1 }
 0x166   : > { %v1426_v58 = vpop.f32.mrb[7].mxu0  ;;  %v1445_v59 = vpop.f32.mrb[5].mxu1 }
 0x167   : > { %v1088_v60 = vadd.f32 %v1424_v34, %v1048_v53  ;;  %v1446_v61 = vadd.f32 %v1445_v59, %v1444_v57  ;;  %v1447_v62 = vpop.f32.mrb[6].mxu1 }
 0x168   : > { %v1448_v63 = vpop.f32.mrb[7].mxu1 }
 0x169   : > { %v1128_v0 = vadd.f32 %v1446_v61, %v1088_v60 }
 0x183   : > { %v1466_v1 = vpop.f32.mrb[8].mxu0 }
 0x184   : > { %v1467_v2 = vpop.f32.mrb[9].mxu0 }
 0x185   : > { %v1468_v3 = vadd.f32 %v1467_v2, %v1466_v1  ;;  %v1469_v4 = vpop.f32.mrb[10].mxu0 }
 0x186   : > { %v1470_v5 = vpop.f32.mrb[11].mxu0 }
 0x187   : > { %v1168_v6 = vadd.f32 %v1468_v3, %v1128_v0 }
 0x189   : > { %1173 = vst [vmem:[%s239_s15] sm:$0x3] %v1168_v6 }
 0x18a PF: > { %p16_p11 = scmp.ge.s32.totalorder %s1751_s17, 6   ;;  %s2004_s12 = smov %s1694_s13 }
 0x18b   : > { %s2005_s13 = smov %s1698_s14  ;;  %s2006_s14 = smov %s1761_s20 }
 0x18c   : > { %s2007_s15 = smov %s1751_s17  ;;  %18 = sbr.rel (!%p16_p11) target bundleno = 5 (0x5), region = 88 }
 0x193   :  { %1193 = vsyncpa [#allocation3], 1 }
 0x194   :  { %1195 = vsyncpa [#allocation3 + $0x1], 1 }
 0x195   :  { %1196 = vsyncpa [#allocation5], 1 }
 0x196   :  { %1198 = vsyncpa [#allocation5 + $0x1], 1 }

</bundles_post_ra>
